<compile_context>
chip_gen: v6e
topology: v6e:2x2x1
jax: 0.10.0
libtpu: 0.0.40
codegen_flags: <defaults>
</compile_context>

<pallas_src>
import math
from functools import partial

import jax
import jax.numpy as jnp
from jax.experimental import pallas as pl
from jax.experimental.pallas import tpu as pltpu

_INV_SQRT2 = 1.0 / math.sqrt(2.0)


def _round_up(x, m):
    return ((x + m - 1) // m) * m


def _cdiv(a, b):
    return -(-a // b)


def _vmem_budget_bytes():
    """3/4 of physical VMEM (leaves headroom for compiler scratch on every gen)."""
    cap = 64 * 1024 * 1024  # conservative fallback (v7x per-TC physical VMEM)
    try:
        info = pltpu.get_tpu_info()
        cap = int(getattr(info, "vmem_capacity_bytes", cap))
    except Exception:
        pass
    return (3 * cap) // 4


def _gelu(h, approx):
    """GELU in h.dtype. approx=False -> exact erf (torch default), computed in f32."""
    if approx:
        c0 = jnp.asarray(0.7978845608028654, h.dtype)   # sqrt(2/pi)
        c1 = jnp.asarray(0.044715, h.dtype)
        u = c0 * (h + c1 * h * h * h)
        # tanh routed to the (otherwise idle) EUP; evaluated in f32 for portability
        # across v5e (no bf16 EUP) while the polynomial mults stay in h.dtype.
        t = jnp.tanh(u.astype(jnp.float32)).astype(h.dtype)
        return 0.5 * h * (1.0 + t)
    hf = h.astype(jnp.float32)
    return (0.5 * hf * (1.0 + jax.lax.erf(hf * _INV_SQRT2))).astype(h.dtype)


def _ffn_kernel_fused(x_ref, w1_ref, b1_ref, w2_ref, b2_ref, gamma_ref, beta_ref,
                      o_ref, *, eps, approx_gelu, low_precision_gelu):
    """nk == 1: full hidden dim resident, no accumulator scratch needed."""
    x = x_ref[...]
    h = jnp.dot(x.astype(w1_ref.dtype), w1_ref[...],
                preferred_element_type=jnp.float32)
    h = h + b1_ref[...].astype(jnp.float32)
    gdt = w2_ref.dtype if low_precision_gelu else jnp.float32
    h = _gelu(h.astype(gdt), approx_gelu)
    y = jnp.dot(h.astype(w2_ref.dtype), w2_ref[...],
                preferred_element_type=jnp.float32)
    y = y + b2_ref[...].astype(jnp.float32)
    # TODO(synk): dropout is identity (eval-mode); training-mode dropout would use
    # pltpu.prng_seed + pltpu.prng_random_bits masking here.
    z = x.astype(jnp.float32) + y
    mean = jnp.mean(z, axis=-1, keepdims=True)
    zc = z - mean
    var = jnp.mean(zc * zc, axis=-1, keepdims=True)   # two-pass variance (torch-like)
    out = zc * jax.lax.rsqrt(var + eps)
    out = out * gamma_ref[...].astype(jnp.float32) + beta_ref[...].astype(jnp.float32)
    o_ref[...] = out.astype(o_ref.dtype)


def _ffn_kernel_ktiled(x_ref, w1_ref, b1_ref, w2_ref, b2_ref, gamma_ref, beta_ref,
                       o_ref, y_acc, *, eps, approx_gelu, low_precision_gelu):
    """nk > 1: hidden dim tiled over an 'arbitrary' reduction axis, f32 accumulator."""
    k = pl.program_id(1)
    nk = pl.num_programs(1)

    @pl.when(k == 0)
    def _():
        y_acc[...] = jnp.zeros_like(y_acc)

    x = x_ref[...]
    h = jnp.dot(x.astype(w1_ref.dtype), w1_ref[...],
                preferred_element_type=jnp.float32)
    h = h + b1_ref[...].astype(jnp.float32)
    gdt = w2_ref.dtype if low_precision_gelu else jnp.float32
    h = _gelu(h.astype(gdt), approx_gelu)
    y_acc[...] += jnp.dot(h.astype(w2_ref.dtype), w2_ref[...],
                          preferred_element_type=jnp.float32)

    @pl.when(k == nk - 1)
    def _():
        y = y_acc[...] + b2_ref[...].astype(jnp.float32)
        z = x.astype(jnp.float32) + y   # dropout == identity (eval mode)
        mean = jnp.mean(z, axis=-1, keepdims=True)
        zc = z - mean
        var = jnp.mean(zc * zc, axis=-1, keepdims=True)
        out = zc * jax.lax.rsqrt(var + eps)
        out = out * gamma_ref[...].astype(jnp.float32) + beta_ref[...].astype(jnp.float32)
        o_ref[...] = out.astype(o_ref.dtype)


def _select_tiles(T, E, H, x_isz, w_isz, budget, sub, tm_req, th_req):
    """Pick (tm, th) so the double-buffered working set fits the VMEM budget."""
    t_sub = _round_up(max(T, 1), sub)

    def fits(tm, th):
        vmem = (4 * tm * E * x_isz          # x tile + out tile, double-buffered
                + 4 * E * th * w_isz        # W1 + W2 slices, double-buffered
                + 2 * (th + 3 * E) * w_isz  # b1, b2, gamma, beta
                + tm * E * 4                # f32 output accumulator / epilogue
                + tm * th * 4)              # f32 hidden activations
        return vmem <= budget

    # --- token tile ---
    if tm_req is not None:
        tm = _round_up(max(sub, min(tm_req, t_sub)), sub)
    else:
        tm = min(_round_up(1024, sub), t_sub)
        # keep >= 2 token tiles so the "parallel" axis can shard across TCs (v7x)
        if tm >= t_sub and t_sub > sub:
            tm = _round_up(_cdiv(t_sub, 2), sub)

    # --- hidden tile ---
    if th_req is not None:
        th = H if th_req >= H else _round_up(min(th_req, H), 128)
        return tm, th

    th = None
    cand_tm = tm
    while th is None:
        if fits(cand_tm, H):
            th = H                      # full weight residency: W1/W2 DMA'd once
        else:
            for c in (2048, 1024, 512, 256, 128):
                if c < H and fits(cand_tm, c):
                    th = c
                    break
        if th is None:
            if cand_tm > 256:
                cand_tm = max(256, cand_tm // 2)   # shrink token tile before giving up
            else:
                th = 128                           # last resort
    return min(tm, cand_tm), th


def positional_feed_forward(x, w1, b1, w2, b2, gamma, beta, *,
                            eps=1e-5, tm=None, th=None,
                            approx_gelu=False, low_precision_gelu=False,
                            vmem_limit_bytes=None):
    """x: (..., E). Returns LayerNorm(x + gelu(x @ W1 + b1) @ W2 + b2)."""
    orig_shape = x.shape
    E = orig_shape[-1]
    H = w1.shape[1]
    x2 = x.reshape(-1, E)
    T = x2.shape[0]

    x_isz = jnp.dtype(x.dtype).itemsize
    w_isz = jnp.dtype(w1.dtype).itemsize

    budget = int(vmem_limit_bytes) if vmem_limit_bytes is not None else _vmem_budget_bytes()
    sub = max(8, 32 // x_isz)   # packed sublane multiple: 8 f32 / 16 bf16 / 32 int8-fp8

    tm_sel, th_sel = _select_tiles(T, E, H, x_isz, w_isz, budget, sub, tm, th)

    T_pad = _round_up(T, tm_sel)
    if T_pad != T:
        x2 = jnp.pad(x2, ((0, T_pad - T), (0, 0)))

    if th_sel >= H:
        th_sel = H
        H_pad = H
    else:
        H_pad = _round_up(H, th_sel)
    if H_pad != H:
        # zero-padded hidden columns: gelu(0 + 0) = 0 and zero W2 rows -> no effect
        w1 = jnp.pad(w1, ((0, 0), (0, H_pad - H)))
        b1 = jnp.pad(b1, (0, H_pad - H))
        w2 = jnp.pad(w2, ((0, H_pad - H), (0, 0)))

    # TODO(synk): optional fp8 weight quantization (v7x MXU) with per-channel scales
    # folded into the f32 accumulator path would halve weight bytes again.

    b1_2 = b1.reshape(1, H_pad)
    b2_2 = b2.reshape(1, E)
    g_2 = gamma.reshape(1, E)
    bt_2 = beta.reshape(1, E)

    nt = T_pad // tm_sel
    nk = H_pad // th_sel

    # Advisory cost: x/out streamed once; W1/W2 streamed once when resident (nk==1,
    # constant block index), otherwise once per token tile (index wraps every k loop).
    w_passes = 1 if nk == 1 else nt
    cost = pl.CostEstimate(
        flops=4 * T_pad * E * H_pad,
        transcendentals=T_pad * H_pad,
        bytes_accessed=int(2 * T_pad * E * x_isz
                           + w_passes * 2 * E * H_pad * w_isz
                           + (H_pad + 3 * E) * w_isz))

    common = dict(eps=eps, approx_gelu=approx_gelu,
                  low_precision_gelu=low_precision_gelu)

    if nk == 1:
        grid_spec = pltpu.PrefetchScalarGridSpec(
            num_scalar_prefetch=0,
            grid=(nt,),
            in_specs=[
                pl.BlockSpec((tm_sel, E), lambda i: (i, 0)),   # x tile
                pl.BlockSpec((E, H_pad), lambda i: (0, 0)),    # W1 (resident, one DMA)
                pl.BlockSpec((1, H_pad), lambda i: (0, 0)),    # b1
                pl.BlockSpec((H_pad, E), lambda i: (0, 0)),    # W2 (resident, one DMA)
                pl.BlockSpec((1, E), lambda i: (0, 0)),        # b2
                pl.BlockSpec((1, E), lambda i: (0, 0)),        # gamma
                pl.BlockSpec((1, E), lambda i: (0, 0)),        # beta
            ],
            out_specs=pl.BlockSpec((tm_sel, E), lambda i: (i, 0)))
        kernel = partial(_ffn_kernel_fused, **common)
        dims = ("parallel",)
    else:
        grid_spec = pltpu.PrefetchScalarGridSpec(
            num_scalar_prefetch=0,
            grid=(nt, nk),                                      # reduction axis last
            in_specs=[
                pl.BlockSpec((tm_sel, E), lambda i, k: (i, 0)),   # x tile (reused over k)
                pl.BlockSpec((E, th_sel), lambda i, k: (0, k)),   # W1[:, k-th slice]
                pl.BlockSpec((1, th_sel), lambda i, k: (0, k)),   # b1 slice
                pl.BlockSpec((th_sel, E), lambda i, k: (k, 0)),   # W2[k-th slice, :]
                pl.BlockSpec((1, E), lambda i, k: (0, 0)),        # b2
                pl.BlockSpec((1, E), lambda i, k: (0, 0)),        # gamma
                pl.BlockSpec((1, E), lambda i, k: (0, 0)),        # beta
            ],
            out_specs=pl.BlockSpec((tm_sel, E), lambda i, k: (i, 0)),
            scratch_shapes=[pltpu.VMEM((tm_sel, E), jnp.float32)])
        kernel = partial(_ffn_kernel_ktiled, **common)
        dims = ("parallel", "arbitrary")

    out = pl.pallas_call(
        kernel,
        out_shape=jax.ShapeDtypeStruct((T_pad, E), x.dtype),
        grid_spec=grid_spec,
        compiler_params=pltpu.CompilerParams(
            dimension_semantics=dims,
            vmem_limit_bytes=int(budget)),
        cost_estimate=cost,
    )(x2, w1, b1_2, w2, b2_2, g_2, bt_2)

    if T_pad != T:
        out = out[:T]
    return out.reshape(orig_shape)


def init_params(key, embedding_dim, hidden_dim, dtype=jnp.float32):
    """Deterministic parameter init matching the PyTorch module's __init__."""
    k1, k2, k3, k4 = jax.random.split(key, 4)
    std1 = math.sqrt(2.0 / (embedding_dim + hidden_dim))   # xavier_normal_
    std2 = math.sqrt(2.0 / (hidden_dim + embedding_dim))
    # stored as (in, out) so the kernel computes x @ W
    w1 = (jax.random.normal(k1, (embedding_dim, hidden_dim)) * std1).astype(dtype)
    w2 = (jax.random.normal(k2, (hidden_dim, embedding_dim)) * std2).astype(dtype)
    bound1 = 1.0 / math.sqrt(embedding_dim)                # nn.Linear default bias init
    bound2 = 1.0 / math.sqrt(hidden_dim)
    b1 = jax.random.uniform(k3, (hidden_dim,), minval=-bound1, maxval=bound1).astype(dtype)
    b2 = jax.random.uniform(k4, (embedding_dim,), minval=-bound2, maxval=bound2).astype(dtype)
    gamma = jnp.ones((embedding_dim,), dtype)
    beta = jnp.zeros((embedding_dim,), dtype)
    return w1, b1, w2, b2, gamma, beta


def _reference(x, w1, b1, w2, b2, gamma, beta, eps=1e-5, approximate=False):
    xf = x.astype(jnp.float32)
    h = jnp.dot(xf, w1.astype(jnp.float32)) + b1.astype(jnp.float32)
    h = jax.nn.gelu(h, approximate=approximate)
    y = jnp.dot(h, w2.astype(jnp.float32)) + b2.astype(jnp.float32)
    z = xf + y
    mean = jnp.mean(z, axis=-1, keepdims=True)
    var = jnp.mean((z - mean) ** 2, axis=-1, keepdims=True)
    return ((z - mean) / jnp.sqrt(var + eps) * gamma.astype(jnp.float32)
            + beta.astype(jnp.float32))


if __name__ == "__main__":
    key = jax.random.PRNGKey(0)
    ks = jax.random.split(key, 6)

    # Test 1: small module-like shapes -> fused (nk=1, weight-resident) path.
    batch, seq, embedding_dim, hidden_dim = 2, 8, 32, 64
    x = jax.random.normal(ks[0], (batch, seq, embedding_dim), dtype=jnp.float32)
    params = init_params(ks[1], embedding_dim, hidden_dim)
    out = jax.block_until_ready(positional_feed_forward(x, *params))
    ref = _reference(x, *params)
    assert out.shape == x.shape
    assert jnp.allclose(out, ref, atol=1e-4, rtol=1e-4), "mismatch vs JAX reference (1)"

    # Test 2: token padding (T=26 -> tiles of 16) and the H-tiled accumulation
    # fallback (H=384, th=128 -> 3 reduction steps).
    b2_, s2_, e2_, h2_ = 2, 13, 128, 384
    x2 = jax.random.normal(ks[2], (b2_, s2_, e2_), dtype=jnp.float32)
    params2 = init_params(ks[3], e2_, h2_)
    out2 = jax.block_until_ready(positional_feed_forward(x2, *params2, th=128))
    ref2 = _reference(x2, *params2)
    assert out2.shape == x2.shape
    assert jnp.allclose(out2, ref2, atol=1e-4, rtol=1e-4), "mismatch vs JAX reference (2)"

    # Test 3: bf16 weights + activations (native MXU path), tanh-approx GELU with
    # the polynomial in bf16 — the fast path suggested for v6e/v7x.
    b3_, s3_, e3_, h3_ = 2, 17, 256, 512
    x3 = jax.random.normal(ks[4], (b3_, s3_, e3_), dtype=jnp.float32).astype(jnp.bfloat16)
    params3 = init_params(ks[5], e3_, h3_, dtype=jnp.bfloat16)
    out3 = jax.block_until_ready(positional_feed_forward(
        x3, *params3, approx_gelu=True, low_precision_gelu=True))
    ref3 = _reference(x3, *params3, approximate=True)
    assert out3.shape == x3.shape
    assert jnp.allclose(out3.astype(jnp.float32), ref3, atol=6e-2, rtol=6e-2), \
        "mismatch vs JAX reference (3, bf16)"

    print("KERNEL_OK")
</pallas_src>

<mosaic_0001>
module attributes {stable_mosaic.version = 11 : i64} {
  func.func @_ffn_kernel_fused(%arg0: i32, %arg1: memref<8x32xf32, #tpu.memory_space<vmem>>, %arg2: memref<32x64xf32, #tpu.memory_space<vmem>>, %arg3: memref<1x64xf32, #tpu.memory_space<vmem>>, %arg4: memref<64x32xf32, #tpu.memory_space<vmem>>, %arg5: memref<1x32xf32, #tpu.memory_space<vmem>>, %arg6: memref<1x32xf32, #tpu.memory_space<vmem>>, %arg7: memref<1x32xf32, #tpu.memory_space<vmem>>, %arg8: memref<8x32xf32, #tpu.memory_space<vmem>>) attributes {dimension_semantics = [#tpu.dimension_semantics<parallel>], iteration_bounds = array<i64: 2>, scalar_prefetch = 0 : i64, scratch_operands = 0 : i64, tpu.core_type = #tpu.core_type<tc>, window_params = [{transform_indices = @transform_0, window_bounds = array<i64: 8, 32>}, {pipeline_mode = #tpu.pipeline_mode<synchronous>, transform_indices = @transform_1, window_bounds = array<i64: 32, 64>}, {pipeline_mode = #tpu.pipeline_mode<synchronous>, transform_indices = @transform_2, window_bounds = array<i64: 1, 64>}, {pipeline_mode = #tpu.pipeline_mode<synchronous>, transform_indices = @transform_3, window_bounds = array<i64: 64, 32>}, {pipeline_mode = #tpu.pipeline_mode<synchronous>, transform_indices = @transform_4, window_bounds = array<i64: 1, 32>}, {pipeline_mode = #tpu.pipeline_mode<synchronous>, transform_indices = @transform_5, window_bounds = array<i64: 1, 32>}, {pipeline_mode = #tpu.pipeline_mode<synchronous>, transform_indices = @transform_6, window_bounds = array<i64: 1, 32>}, {transform_indices = @transform_7, window_bounds = array<i64: 8, 32>}]} {
    %c0 = arith.constant 0 : index
    %c0_0 = arith.constant 0 : index
    %0 = vector.load %arg1[%c0, %c0_0] : memref<8x32xf32, #tpu.memory_space<vmem>>, vector<8x32xf32>
    %c0_1 = arith.constant 0 : index
    %c0_2 = arith.constant 0 : index
    %1 = vector.load %arg2[%c0_1, %c0_2] : memref<32x64xf32, #tpu.memory_space<vmem>>, vector<32x64xf32>
    %cst = arith.constant dense<0.000000e+00> : vector<8x64xf32>
    %2 = tpu.matmul %0, %1, %cst {dimension_numbers = #tpu.dot_dimension_numbers<[1], [0], [0], [1], [0, 0, 1, 1], [], []>} : vector<8x32xf32>, vector<32x64xf32>, vector<8x64xf32> -> vector<8x64xf32>
    %c0_3 = arith.constant 0 : index
    %c0_4 = arith.constant 0 : index
    %3 = vector.load %arg3[%c0_3, %c0_4] : memref<1x64xf32, #tpu.memory_space<vmem>>, vector<1x64xf32>
    %4 = vector.broadcast %3 : vector<1x64xf32> to vector<8x64xf32>
    %5 = arith.addf %2, %4 : vector<8x64xf32>
    %cst_5 = arith.constant 5.000000e-01 : f32
    %6 = vector.broadcast %cst_5 : f32 to vector<8x64xf32>
    %7 = arith.mulf %6, %5 : vector<8x64xf32>
    %cst_6 = arith.constant 0.707106769 : f32
    %8 = vector.broadcast %cst_6 : f32 to vector<8x64xf32>
    %9 = arith.mulf %5, %8 : vector<8x64xf32>
    %10 = math.erf %9 : vector<8x64xf32>
    %cst_7 = arith.constant 1.000000e+00 : f32
    %11 = vector.broadcast %cst_7 : f32 to vector<8x64xf32>
    %12 = arith.addf %11, %10 : vector<8x64xf32>
    %13 = arith.mulf %7, %12 : vector<8x64xf32>
    %c0_8 = arith.constant 0 : index
    %c0_9 = arith.constant 0 : index
    %14 = vector.load %arg4[%c0_8, %c0_9] : memref<64x32xf32, #tpu.memory_space<vmem>>, vector<64x32xf32>
    %cst_10 = arith.constant dense<0.000000e+00> : vector<8x32xf32>
    %15 = tpu.matmul %13, %14, %cst_10 {dimension_numbers = #tpu.dot_dimension_numbers<[1], [0], [0], [1], [0, 0, 1, 1], [], []>} : vector<8x64xf32>, vector<64x32xf32>, vector<8x32xf32> -> vector<8x32xf32>
    %c0_11 = arith.constant 0 : index
    %c0_12 = arith.constant 0 : index
    %16 = vector.load %arg5[%c0_11, %c0_12] : memref<1x32xf32, #tpu.memory_space<vmem>>, vector<1x32xf32>
    %17 = vector.broadcast %16 : vector<1x32xf32> to vector<8x32xf32>
    %18 = arith.addf %15, %17 : vector<8x32xf32>
    %19 = arith.addf %0, %18 : vector<8x32xf32>
    %cst_13 = arith.constant dense<0.000000e+00> : vector<8xf32>
    %20 = vector.multi_reduction <add>, %19, %cst_13 [1] : vector<8x32xf32> to vector<8xf32>
    %21 = vector.shape_cast %20 : vector<8xf32> to vector<8x1xf32>
    %cst_14 = arith.constant 3.200000e+01 : f32
    %22 = vector.broadcast %cst_14 : f32 to vector<8x1xf32>
    %23 = arith.divf %21, %22 : vector<8x1xf32>
    %24 = vector.broadcast %23 : vector<8x1xf32> to vector<8x32xf32>
    %25 = arith.subf %19, %24 : vector<8x32xf32>
    %26 = arith.mulf %25, %25 : vector<8x32xf32>
    %cst_15 = arith.constant dense<0.000000e+00> : vector<8xf32>
    %27 = vector.multi_reduction <add>, %26, %cst_15 [1] : vector<8x32xf32> to vector<8xf32>
    %28 = vector.shape_cast %27 : vector<8xf32> to vector<8x1xf32>
    %cst_16 = arith.constant 3.200000e+01 : f32
    %29 = vector.broadcast %cst_16 : f32 to vector<8x1xf32>
    %30 = arith.divf %28, %29 : vector<8x1xf32>
    %cst_17 = arith.constant 9.99999974E-6 : f32
    %31 = vector.broadcast %cst_17 : f32 to vector<8x1xf32>
    %32 = arith.addf %30, %31 : vector<8x1xf32>
    %33 = math.rsqrt %32 : vector<8x1xf32>
    %34 = vector.broadcast %33 : vector<8x1xf32> to vector<8x32xf32>
    %35 = arith.mulf %25, %34 : vector<8x32xf32>
    %c0_18 = arith.constant 0 : index
    %c0_19 = arith.constant 0 : index
    %36 = vector.load %arg6[%c0_18, %c0_19] : memref<1x32xf32, #tpu.memory_space<vmem>>, vector<1x32xf32>
    %37 = vector.broadcast %36 : vector<1x32xf32> to vector<8x32xf32>
    %38 = arith.mulf %35, %37 : vector<8x32xf32>
    %c0_20 = arith.constant 0 : index
    %c0_21 = arith.constant 0 : index
    %39 = vector.load %arg7[%c0_20, %c0_21] : memref<1x32xf32, #tpu.memory_space<vmem>>, vector<1x32xf32>
    %40 = vector.broadcast %39 : vector<1x32xf32> to vector<8x32xf32>
    %41 = arith.addf %38, %40 : vector<8x32xf32>
    %c0_22 = arith.constant 0 : index
    %c0_23 = arith.constant 0 : index
    %42 = vector.load %arg8[%c0_22, %c0_23] : memref<8x32xf32, #tpu.memory_space<vmem>>, vector<8x32xf32>
    tpu.vector_store %arg8[%c0_22, %c0_23], %41 {strides = array<i32>} : memref<8x32xf32, #tpu.memory_space<vmem>>, vector<8x32xf32>,
    return
  }
  func.func @transform_0(%arg0: i32) -> (i32, i32) {
    %c0_i32 = arith.constant 0 : i32
    %c0_i32_0 = arith.constant 0 : i32
    return %arg0, %c0_i32 : i32, i32
  }
  func.func @transform_1(%arg0: i32) -> (i32, i32) {
    %c0_i32 = arith.constant 0 : i32
    %c0_i32_0 = arith.constant 0 : i32
    %c0_i32_1 = arith.constant 0 : i32
    return %c0_i32, %c0_i32_0 : i32, i32
  }
  func.func @transform_2(%arg0: i32) -> (i32, i32) {
    %c0_i32 = arith.constant 0 : i32
    %c0_i32_0 = arith.constant 0 : i32
    %c0_i32_1 = arith.constant 0 : i32
    return %c0_i32, %c0_i32_0 : i32, i32
  }
  func.func @transform_3(%arg0: i32) -> (i32, i32) {
    %c0_i32 = arith.constant 0 : i32
    %c0_i32_0 = arith.constant 0 : i32
    %c0_i32_1 = arith.constant 0 : i32
    return %c0_i32, %c0_i32_0 : i32, i32
  }
  func.func @transform_4(%arg0: i32) -> (i32, i32) {
    %c0_i32 = arith.constant 0 : i32
    %c0_i32_0 = arith.constant 0 : i32
    %c0_i32_1 = arith.constant 0 : i32
    return %c0_i32, %c0_i32_0 : i32, i32
  }
  func.func @transform_5(%arg0: i32) -> (i32, i32) {
    %c0_i32 = arith.constant 0 : i32
    %c0_i32_0 = arith.constant 0 : i32
    %c0_i32_1 = arith.constant 0 : i32
    return %c0_i32, %c0_i32_0 : i32, i32
  }
  func.func @transform_6(%arg0: i32) -> (i32, i32) {
    %c0_i32 = arith.constant 0 : i32
    %c0_i32_0 = arith.constant 0 : i32
    %c0_i32_1 = arith.constant 0 : i32
    return %c0_i32, %c0_i32_0 : i32, i32
  }
  func.func @transform_7(%arg0: i32) -> (i32, i32) {
    %c0_i32 = arith.constant 0 : i32
    %c0_i32_0 = arith.constant 0 : i32
    return %arg0, %c0_i32 : i32, i32
  }
}

</mosaic_0001>

<bundles_post_ra>
// kernel: tpu_custom_call.1
= control target key start
LH: loop header
LB: loop body
LE: loop exit
PB: predicated region body
PF: predicated region fallthrough
CT: control target
= control target key end

     0   :  { %12 = vsyncpa [#allocation3], 0  ;;  %s908_s0 = inlined_call_operand.vmem [shape: f32[16,32], index: 0, kind: input, shape index: {}]   ;;  %s909_s1 = inlined_call_operand.vmem [shape: f32[32,64], index: 1, kind: input, shape index: {}]   ;;  %s910_s2 = inlined_call_operand.vmem [shape: f32[1,64], index: 2, kind: input, shape index: {}]   ;;  %s911_s3 = inlined_call_operand.vmem [shape: f32[64,32], index: 3, kind: input, shape index: {}]   ;;  %s912_s4 = inlined_call_operand.vmem [shape: f32[1,32], index: 4, kind: input, shape index: {}]   ;;  %s913_s5 = inlined_call_operand.vmem [shape: f32[1,32], index: 5, kind: input, shape index: {}]   ;;  %s914_s6 = inlined_call_operand.vmem [shape: f32[1,32], index: 6, kind: input, shape index: {}]   ;;  %s915_s7 = inlined_call_operand.hbm [shape: f32[16,32], index: 7, kind: output, shape index: {}]  }
   0x1   :  { %14 = vsyncpa [#allocation3 + $0x1], 0  ;;  %s769_s24 = smov 0   ;;  %s771_s25 = smov 0  }
   0x2   :  { %s773_s26 = smov 0   ;;  %s775_s27 = smov 0  }
   0x3 LB: > { %s790_s28 = sadd.s32 4294967295, %s724_s27   ;;  %s559_s29 = sadd.s32 4294967294, %s724_s27   ;;  %s724_s27 = sphi %s775_s27, %s921_s27   ;;  %s720_s26 = sphi %s773_s26, %s920_s26   ;;  %s716_s25 = sphi %s771_s25, %s919_s25   ;;  %s712_s24 = sphi %s769_s24, %s918_s24  }
   0x4   : > { %s794_s30 = sadd.s32 1, %s724_s27   ;;  %s179_s8 = sadd.s32 1, %s720_s26 }
   0x5   : > { %s176_s9 = ssub.s32 %s724_s27, %s794_s30  ;;  %p189_p0 = scmp.ne.s32.totalorder %s720_s26, %s716_s25 }
   0x6   : > { %p177_p1 = scmp.eq.s32.totalorder %s176_s9, 0  ;;  %p190_p2 = scmp.eq.s32.totalorder %s790_s28, 1 }
   0x7   : > { %p195_p3 = scmp.ne.s32.totalorder %s716_s25, %s712_s24  ;;  %p196_p4 = scmp.eq.s32.totalorder %s559_s29, 1 }
   0x8   : > { %s805_s10 = scalar_select %p177_p1, %s720_s26, %s179_s8  }
   0x9   : > { %p807_p5 = por %p190_p2, %p189_p0  ;;  %p811_p6 = por %p196_p4, %p195_p3 }
   0xa   : > { %p562_p7 = scmp.ge.s32.totalorder %s724_s27, 1  ;;  %p239_p8 = scmp.lt.s32.totalorder %s724_s27, 3 }
   0xc   : > { %p240_p9 = pnand %p562_p7, %p239_p8 }
   0xd   : > { %p270_p10 = scmp.lt.s32.totalorder (!%p240_p9), %s790_s28, 1  ;;  %s267_s18 = sand.u32 (!%p240_p9), 1, %s716_s25  }
   0xe   : > { %243 = sbr.rel (%p240_p9) target bundleno = 761 (0x2f9), region = 48  ;;  %s563_s19 = sshll.u32 (!%p240_p9), %s267_s18, 3 }
   0xf   : > { %s572_s29 = sshll.u32 (!%p240_p9), %s790_s28, 7  ;;  %s487_s16 = scalar_lea.sflag (!%p240_p9), [#allocation3], %s267_s18 }
  0x10   : > { %s498_s15 = scalar_lea.hbm (!%p240_p9), %s915_s7, %s572_s29 }
  0x13   : > { %v278_v0 = vld [vmem:[%s909_s1 + $0x18] sm:$0xff]  ;;  %v726_v1 = vmov 0.0   ;;  %v277_v2 = vld [vmem:[%s909_s1 + $0x10] sm:$0xff]  ;;  %vm727_vm0 = vmmov 0   ;;  %s271_s17 = scalar_select %p270_p10, %s790_s28, 1  ;;  %v276_v3 = vld [vmem:[%s909_s1 + $0x8] sm:$0xff] }
  0x14   : > { %589 = vmatprep.subr.mxu0 %v726_v1  ;;  %597 = vmatprep.mubr.msk.f32.mxu0 %vm727_vm0, %v726_v1  ;;  %v275_v4 = vld [vmem:[%s909_s1] sm:$0xff]  ;;  %vm286_vm1 = vcmask 261120   ;;  %v372_v6 = vld [vmem:[%s911_s3 + $0x38] sm:$0xff]  ;;  %v371_v7 = vld [vmem:[%s911_s3 + $0x30] sm:$0xff]  ;;  %vm380_vm2 = vcmask 523264  }
  0x15   : > { %590 = vmatpush3.msra.mxu0 %v278_v0  ;;  %600 = vmatprep.subr.mxu1 %v726_v1  ;;  %s564_s20 = sshll.u32 %s271_s17, 3  ;;  %v370_v8 = vld [vmem:[%s911_s3 + $0x28] sm:$0xff]  ;;  %v369_v9 = vld [vmem:[%s911_s3 + $0x20] sm:$0xff]  ;;  %v368_v10 = vld [vmem:[%s911_s3 + $0x18] sm:$0xff] }
  0x16   : > { %591 = vmatprep.subr.mxu0 %v726_v1  ;;  %616 = vmatprep.mubr.msk.f32.mxu1 %vm727_vm0, %v726_v1  ;;  %s273_s8 = scalar_lea.vmem %s908_s0, %s564_s20  ;;  %v367_v11 = vld [vmem:[%s911_s3 + $0x10] sm:$0xff]  ;;  %v366_v12 = vld [vmem:[%s911_s3 + $0x8] sm:$0xff]  ;;  %v365_v13 = vld [vmem:[%s911_s3] sm:$0xff]  ;;  %s728_s20 = smov [#allocation2]  }
  0x17   : > { %592 = vmatpush3.msra.mxu0 %v277_v2  ;;  %v274_v5 = vld [vmem:[%s273_s8] sm:$0xff]  ;;  %601 = vmatpush3.msra.mxu1 %v372_v6  ;;  %s269_s8 = scalar_lea.vmem [#allocation2], %s563_s19  ;;  %s668_s21 = sshll.u32 %s728_s20, 4  ;;  %s669_s21 = int_to_ptr.vmem [resolvable:$false] %s668_s21 }
  0x18   : > { %593 = vmatprep.subr.mxu0 %v726_v1  ;;  %602 = vmatprep.subr.mxu1 %v726_v1  ;;  %v565_v14 = vld [vmem:[%s910_s2] ss:$0 sm:$0xff]  ;;  %s500_s9 = sshll.u32 %s269_s8, 4  ;;  %s670_s28 = scalar_lea.vmem %s669_s21, 256  ;;  %s501_s9 = int_to_ptr.vmem [resolvable:$true] %s500_s9 }
  0x19   : > { %594 = vmatpush3.msra.mxu0 %v276_v3  ;;  %603 = vmatpush3.msra.mxu1 %v371_v7  ;;  %v567_v23 = vld [vmem:[%s912_s4] ss:$0 sm:$0xff]  ;;  %s664_s17 = scalar_lea.vmem %s501_s9, 128  ;;  %p671_p0 = scmp.lt.s32.totalorder %s501_s9, %s669_s21 }
  0x1a   : > { %595 = vmatprep.subr.mxu0 %v726_v1  ;;  %604 = vmatprep.subr.mxu1 %v726_v1  ;;  %v569_v38 = vld [vmem:[%s913_s5] ss:$0 sm:$0xff]  ;;  %p665_p11 = scmp.ne.s32.totalorder %s501_s9, %s664_s17  ;;  %p672_p1 = scmp.lt.s32.totalorder %s670_s28, %s664_s17 }
  0x1b   : > { %596 = vmatpush3.msra.mxu0 %v275_v4  ;;  %605 = vmatpush3.msra.mxu1 %v370_v8  ;;  %v570_v40 = vld [vmem:[%s914_s6] ss:$0 sm:$0xff] }
  0x1c   : > { %598 = vmatmul.mubr.msk.f32.vlgmr.msra.gmra.mxu0 %vm286_vm1, %v274_v5  ;;  %606 = vmatprep.subr.mxu1 %v726_v1  ;;  %p666_p12 = pnand %p665_p11, %p807_p5  ;;  %p673_p2 = por %p672_p1, %p671_p0 }
  0x1d   : > { %607 = vmatpush3.msra.mxu1 %v369_v9 }
  0x1e   : > { %608 = vmatprep.subr.mxu1 %v726_v1  ;;  %p667_p13 = pneg %p666_p12 }
  0x1f   : > { %609 = vmatpush3.msra.mxu1 %v368_v10 }
  0x20   : > { %610 = vmatprep.subr.mxu1 %v726_v1  ;;  %p674_p3 = pnand %p673_p2, %p667_p13 }
  0x21   : > { %611 = vmatpush3.msra.mxu1 %v367_v11 }
  0x22   : > { %612 = vmatprep.subr.mxu1 %v726_v1 }
  0x23   : > { %613 = vmatpush3.msra.mxu1 %v366_v12 }
  0x24   : > { %614 = vmatprep.subr.mxu1 %v726_v1 }
  0x25   : > { %615 = vmatpush3.msra.mxu1 %v365_v13 }
  0xdc   : > { %v356_v15 = vpop.f32.mrf.mxu0 }
  0xdd   : > { %v357_v16 = vadd.f32 %v565_v14, %v356_v15 }
  0xde   : > { %v599_v17 = vpop.f32.mrf.mxu0 }
  0xdf   : > { %v361_v18 = vmul.f32 0.70710677, %v357_v16  ;;  %v360_v20 = vmul.f32 0.5, %v357_v16 }
  0xe1   : > { %660 = verf.f32 %v361_v18 }
  0xee   : > { %v661_v19 = vpop.eup %660 }
  0xef   : > { %v363_v21 = vadd.f32 1.0, %v661_v19 }
  0xf1   : > { %v364_v22 = vmul.f32 %v363_v21, %v360_v20 }
  0xf3   : > { %617 = vmatmul.mubr.msk.f32.vlgmr.msra.gmra.mxu1 %vm380_vm2, %v364_v22 }
 0x1b3   : > { %v450_v24 = vpop.f32.mrf.mxu1 }
 0x1b4   : > { %v451_v25 = vadd.f32 %v567_v23, %v450_v24 }
 0x1b5   : > { %v618_v26 = vpop.f32.mrf.mxu1 }
 0x1b6   : > { %v454_v27 = vadd.f32 %v451_v25, %v274_v5 }
 0x1b8   : > { %v455_v28 = vsel %vm286_vm1, %v454_v27, 0.0 }
 0x1b9   : > { %456 = vadd.xlane.f32.xlu0 %v455_v28 }
 0x242   : > { %v457_v29 = vpop.xlane.xlu0 %456 }
 0x243   : > { %v459_v30 = vmul.f32 0.03125, %v457_v29 }
 0x245   : > { %v460_v31 = vsub.f32 %v454_v27, %v459_v30 }
 0x247   : > { %v461_v32 = vmul.f32 %v460_v31, %v460_v31 }
 0x249   : > { %v462_v33 = vsel %vm286_vm1, %v461_v32, 0.0 }
 0x24a   : > { %463 = vadd.xlane.f32.xlu0 %v462_v33 }
 0x2d3   : > { %v464_v34 = vpop.xlane.xlu0 %463 }
 0x2d4   : > { %v465_v35 = vmul.f32 0.03125, %v464_v34 }
 0x2d6   : > { %v466_v36 = vadd.f32 1e-05, %v465_v35 }
 0x2d8   : > { %662 = vrsqrt.f32 %v466_v36 }
 0x2e5   : > { %v663_v37 = vpop.eup %662 }
 0x2e6   : > { %v468_v39 = vmul.f32 %v663_v37, %v460_v31 }
 0x2e8   : > { %v476_v41 = vmul.f32 %v569_v38, %v468_v39 }
 0x2ea   : > { %v484_v42 = vadd.f32 %v570_v40, %v476_v41 }
 0x2ec   : > { %485 = vst.msk [vmem:[%s269_s8] sm:$0xff] %vm286_vm1, %v484_v42 }
 0x2ed   : > { %677 = shalt.err (!%p674_p3)
}
 0x2ee   : > { %s678_s19 = scalar_lea.hbm %s498_s15, 128  ;;  %s682_s23 = scalar_lea.hbm %s915_s7, 256 }
 0x2ef   : > { %p679_p4 = scmp.ne.s32.totalorder %s498_s15, %s678_s19  ;;  %p683_p9 = scmp.lt.s32.totalorder %s498_s15, %s915_s7 }
 0x2f0   : > { %p684_p10 = scmp.lt.s32.totalorder %s682_s23, %s678_s19 }
 0x2f1   : > { %p680_p7 = pnand %p679_p4, %p807_p5 }
 0x2f2   : > { %p685_p11 = por %p684_p10, %p683_p9 }
 0x2f3   : > { %p681_p8 = pneg %p680_p7 }
 0x2f5   : > { %p686_p12 = pnand %p685_p11, %p681_p8 }
 0x2f7   : > { %689 = shalt.err (!%p686_p12)
}
 0x2f8   : > { %619 = dma.vmem_to_hbm [thread:$0]  (%p807_p5), %s501_s9, 128, %s498_s15, %s487_s16  }
 0x2f9 PF: > { %p625_p13 = scmp.ge.s32.totalorder %s724_s27, 2  ;;  %s512_s13 = sand.u32 1, %s712_s24  }
 0x2fa   : > { %s513_s14 = scalar_lea.sflag [#allocation3], %s512_s13 }
 0x2fb   : > { %p622_p0 = pnand %p625_p13, %p811_p6 }
 0x2fd   : > { %p623_p1 = pneg %p622_p0 }
 0x2ff   : > { %707 = dma.done.wait (%p623_p1), %s513_s14, 128  }
 0x300   : > { %709 = vsyncadd (%p623_p1), %s513_s14, 4294967168  ;;  %p17_p2 = scmp.ge.s32.totalorder %s794_s30, 4   ;;  %s918_s24 = smov %s716_s25 }
 0x301   : > { %s919_s25 = smov %s720_s26  ;;  %s920_s26 = smov %s805_s10 }
 0x302   : > { %s921_s27 = smov %s794_s30  ;;  %19 = sbr.rel (!%p17_p2) target bundleno = 3 (0x3), region = 83 }
 0x307   :  { %518 = vsyncpa [#allocation3], 1 }
 0x308   :  { %520 = vsyncpa [#allocation3 + $0x1], 1 }

</bundles_post_ra>
